<compile_context>
chip_gen: v7x
topology: tpu7x:2x2x1
jax: 0.10.0
libtpu: 0.0.40
codegen_flags: <defaults>
</compile_context>

<pallas_src>
import jax
import jax.numpy as jnp
from jax.experimental import pallas as pl
from jax.experimental.pallas import tpu as pltpu


# Max batch rows gathered per grid step (tuned parameter; clamped to batch).
_TB = 256


def _make_gather_kernel(tb):
    def kernel(uid_ref, iid1_ref, iid2_ref,       # scalar-prefetch ids (SMEM)
               user_tab, item_tab,                # full tables, raw HBM refs (pl.ANY)
               u_out, o1_out, o2_out,             # full outputs, raw HBM refs (pl.ANY)
               sems):                             # DMA semaphores, shape (3,)
        base = pl.program_id(0) * tb

        def issue_row(r, carry):
            b = base + r
            # HBM table row -> HBM output row, directly (no VMEM bounce).
            pltpu.make_async_copy(
                user_tab.at[pl.ds(uid_ref[b], 1), :],
                u_out.at[pl.ds(b, 1), :],
                sems.at[0]).start()
            pltpu.make_async_copy(
                item_tab.at[pl.ds(iid1_ref[b], 1), :],
                o1_out.at[pl.ds(b, 1), :],
                sems.at[1]).start()
            pltpu.make_async_copy(
                item_tab.at[pl.ds(iid2_ref[b], 1), :],
                o2_out.at[pl.ds(b, 1), :],
                sems.at[2]).start()
            return carry

        # Issue all 3*tb row gathers back-to-back so they are all in flight
        # before the first wait (rolled loop: code size independent of tb).
        jax.lax.fori_loop(0, tb, issue_row, 0)

        # Single combined wait per output stream.  DMA semaphores count bytes,
        # so waiting on a (tb, D) dummy descriptor retires exactly the tb
        # (1, D) row copies issued on that semaphore this chunk.
        rows = pl.ds(base, tb)
        pltpu.make_async_copy(u_out.at[rows, :], u_out.at[rows, :], sems.at[0]).wait()
        pltpu.make_async_copy(o1_out.at[rows, :], o1_out.at[rows, :], sems.at[1]).wait()
        pltpu.make_async_copy(o2_out.at[rows, :], o2_out.at[rows, :], sems.at[2]).wait()

    return kernel


def bpr_forward(user_ids, item_ids_1, item_ids_2, user_emb, item_emb, *, tb=_TB):
    """Pallas implementation of BPRModel.forward.

    user_ids, item_ids_1, item_ids_2 : int (B,)
    user_emb : float (n_users, D)
    item_emb : float (n_items, D)
    returns  : (user_embs, item_embs_1, item_embs_2), each (B, D)
    """
    B = int(user_ids.shape[0])
    D = int(user_emb.shape[1])
    dtype = user_emb.dtype

    # Clamp the chunk size to the batch: small batches run as one exact-size
    # chunk with zero padding; large batches use tb-row chunks.
    tb = int(max(1, min(tb, B)))
    n_chunks = -(-B // tb)          # cdiv
    b_pad = n_chunks * tb

    user_ids = user_ids.astype(jnp.int32)
    item_ids_1 = item_ids_1.astype(jnp.int32)
    item_ids_2 = item_ids_2.astype(jnp.int32)
    if b_pad != B:
        pad = b_pad - B
        # Padded slots gather row 0 (always a valid row) and are sliced off.
        user_ids = jnp.pad(user_ids, (0, pad))
        item_ids_1 = jnp.pad(item_ids_1, (0, pad))
        item_ids_2 = jnp.pad(item_ids_2, (0, pad))

    grid_spec = pltpu.PrefetchScalarGridSpec(
        num_scalar_prefetch=3,
        grid=(n_chunks,),
        in_specs=[
            pl.BlockSpec(memory_space=pl.ANY),   # user_emb stays in HBM
            pl.BlockSpec(memory_space=pl.ANY),   # item_emb stays in HBM (passed once)
        ],
        out_specs=[
            pl.BlockSpec(memory_space=pl.ANY),   # written directly by row DMAs
            pl.BlockSpec(memory_space=pl.ANY),
            pl.BlockSpec(memory_space=pl.ANY),
        ],
        scratch_shapes=[pltpu.SemaphoreType.DMA((3,))],   # one sem per stream
    )

    out_shapes = (
        jax.ShapeDtypeStruct((b_pad, D), dtype),
        jax.ShapeDtypeStruct((b_pad, D), dtype),
        jax.ShapeDtypeStruct((b_pad, D), dtype),
    )

    fn = pl.pallas_call(
        _make_gather_kernel(tb),
        grid_spec=grid_spec,
        out_shape=out_shapes,
        compiler_params=pltpu.CompilerParams(
            # Chunks are independent; "arbitrary" is a no-op on 1-TC v5e/v6e.
            # TODO(synk): on v7x flip to ("parallel",) / core_map over
            # create_tensorcore_mesh so both TensorCores split descriptor issue.
            dimension_semantics=("arbitrary",),
        ),
    )
    u_out, i1_out, i2_out = fn(user_ids, item_ids_1, item_ids_2, user_emb, item_emb)
    if b_pad != B:
        u_out, i1_out, i2_out = u_out[:B], i1_out[:B], i2_out[:B]
    return u_out, i1_out, i2_out


def xavier_uniform(key, shape, dtype=jnp.float32):
    # Matches torch.nn.init.xavier_uniform_ for an nn.Embedding weight of
    # shape (num_embeddings, embedding_dim): fan_out=shape[0], fan_in=shape[1].
    fan_out, fan_in = shape
    bound = (6.0 / (fan_in + fan_out)) ** 0.5
    return jax.random.uniform(key, shape, dtype=dtype, minval=-bound, maxval=bound)


if __name__ == "__main__":
    # Small, deterministic problem setup (mirrors the PyTorch module).
    n_users, n_items, embedding_dim = 64, 128, 32
    batch = 16

    key = jax.random.PRNGKey(0)
    k_u, k_i, k_uid, k_i1, k_i2 = jax.random.split(key, 5)

    user_emb = xavier_uniform(k_u, (n_users, embedding_dim))
    item_emb = xavier_uniform(k_i, (n_items, embedding_dim))

    user_ids = jax.random.randint(k_uid, (batch,), 0, n_users, dtype=jnp.int32)
    item_ids_1 = jax.random.randint(k_i1, (batch,), 0, n_items, dtype=jnp.int32)
    item_ids_2 = jax.random.randint(k_i2, (batch,), 0, n_items, dtype=jnp.int32)

    # 1) Default path: single chunk (tb clamped to batch), no padding.
    u_out, i1_out, i2_out = bpr_forward(
        user_ids, item_ids_1, item_ids_2, user_emb, item_emb
    )
    jax.block_until_ready((u_out, i1_out, i2_out))
    assert u_out.shape == (batch, embedding_dim)
    assert i1_out.shape == (batch, embedding_dim)
    assert i2_out.shape == (batch, embedding_dim)
    assert jnp.array_equal(u_out, user_emb[user_ids])
    assert jnp.array_equal(i1_out, item_emb[item_ids_1])
    assert jnp.array_equal(i2_out, item_emb[item_ids_2])

    # 2) Multi-chunk grid path (tb=8 -> 2 chunks of 8 rows).
    u_c, i1_c, i2_c = bpr_forward(
        user_ids, item_ids_1, item_ids_2, user_emb, item_emb, tb=8
    )
    jax.block_until_ready((u_c, i1_c, i2_c))
    assert jnp.array_equal(u_c, user_emb[user_ids])
    assert jnp.array_equal(i1_c, item_emb[item_ids_1])
    assert jnp.array_equal(i2_c, item_emb[item_ids_2])

    # 3) Padded path: B=11 with tb=6 -> 2 chunks, 1 padded row sliced off.
    bs = 11
    u2, i12, i22 = bpr_forward(
        user_ids[:bs], item_ids_1[:bs], item_ids_2[:bs], user_emb, item_emb, tb=6
    )
    jax.block_until_ready((u2, i12, i22))
    assert jnp.array_equal(u2, user_emb[user_ids[:bs]])
    assert jnp.array_equal(i12, item_emb[item_ids_1[:bs]])
    assert jnp.array_equal(i22, item_emb[item_ids_2[:bs]])

    print("KERNEL_OK")
</pallas_src>

<mosaic_0001>
module attributes {stable_mosaic.version = 11 : i64} {
  func.func @kernel(%arg0: i32, %arg1: memref<16xi32, #tpu.memory_space<smem>>, %arg2: memref<16xi32, #tpu.memory_space<smem>>, %arg3: memref<16xi32, #tpu.memory_space<smem>>, %arg4: memref<64x32xf32, #tpu.memory_space<any>>, %arg5: memref<128x32xf32, #tpu.memory_space<any>>, %arg6: memref<16x32xf32, #tpu.memory_space<any>>, %arg7: memref<16x32xf32, #tpu.memory_space<any>>, %arg8: memref<16x32xf32, #tpu.memory_space<any>>, %arg9: memref<3x!tpu.dma_semaphore, #tpu.memory_space<semaphore_mem>>) attributes {dimension_semantics = [#tpu.dimension_semantics<arbitrary>], iteration_bounds = array<i64: 1>, scalar_prefetch = 3 : i64, scratch_operands = 1 : i64, tpu.core_type = #tpu.core_type<tc>, window_params = [{}, {}, {}, {}, {}]} {
    %c16_i32 = arith.constant 16 : i32
    %0 = arith.muli %arg0, %c16_i32 : i32
    %c0_i32 = arith.constant 0 : i32
    %c16_i32_0 = arith.constant 16 : i32
    %1 = arith.addi %c0_i32, %c16_i32_0 : i32
    %c1_i32 = arith.constant 1 : i32
    scf.for %arg10 = %c0_i32 to %1 step %c1_i32  : i32 {
      %14 = arith.addi %0, %arg10 : i32
      %15 = arith.index_cast %14 : i32 to index
      %16 = memref.load %arg1[%15] : memref<16xi32, #tpu.memory_space<smem>>
      %c0_i32_10 = arith.constant 0 : i32
      %c0_i32_11 = arith.constant 0 : i32
      %17 = tpu.memref_slice %arg4[%16, %c0_i32_11] : memref<64x32xf32, #tpu.memory_space<any>> -> memref<1x32xf32, #tpu.memory_space<any>>
      %c0_i32_12 = arith.constant 0 : i32
      %18 = tpu.memref_slice %arg6[%14, %c0_i32_12] : memref<16x32xf32, #tpu.memory_space<any>> -> memref<1x32xf32, #tpu.memory_space<any>>
      %19 = tpu.memref_slice %arg9[%c0_i32_10] : memref<3x!tpu.dma_semaphore, #tpu.memory_space<semaphore_mem>> -> memref<1x!tpu.dma_semaphore, #tpu.memory_space<semaphore_mem>>
      %20 = tpu.memref_squeeze %19 : memref<1x!tpu.dma_semaphore, #tpu.memory_space<semaphore_mem>> -> memref<!tpu.dma_semaphore, #tpu.memory_space<semaphore_mem>>
      tpu.enqueue_dma source(%17 : memref<1x32xf32, #tpu.memory_space<any>>) target(%18 : memref<1x32xf32, #tpu.memory_space<any>>) target_semaphore(%20 : memref<!tpu.dma_semaphore, #tpu.memory_space<semaphore_mem>>)
      %21 = arith.index_cast %14 : i32 to index
      %22 = memref.load %arg2[%21] : memref<16xi32, #tpu.memory_space<smem>>
      %c1_i32_13 = arith.constant 1 : i32
      %c0_i32_14 = arith.constant 0 : i32
      %23 = tpu.memref_slice %arg5[%22, %c0_i32_14] : memref<128x32xf32, #tpu.memory_space<any>> -> memref<1x32xf32, #tpu.memory_space<any>>
      %c0_i32_15 = arith.constant 0 : i32
      %24 = tpu.memref_slice %arg7[%14, %c0_i32_15] : memref<16x32xf32, #tpu.memory_space<any>> -> memref<1x32xf32, #tpu.memory_space<any>>
      %25 = tpu.memref_slice %arg9[%c1_i32_13] : memref<3x!tpu.dma_semaphore, #tpu.memory_space<semaphore_mem>> -> memref<1x!tpu.dma_semaphore, #tpu.memory_space<semaphore_mem>>
      %26 = tpu.memref_squeeze %25 : memref<1x!tpu.dma_semaphore, #tpu.memory_space<semaphore_mem>> -> memref<!tpu.dma_semaphore, #tpu.memory_space<semaphore_mem>>
      tpu.enqueue_dma source(%23 : memref<1x32xf32, #tpu.memory_space<any>>) target(%24 : memref<1x32xf32, #tpu.memory_space<any>>) target_semaphore(%26 : memref<!tpu.dma_semaphore, #tpu.memory_space<semaphore_mem>>)
      %27 = arith.index_cast %14 : i32 to index
      %28 = memref.load %arg3[%27] : memref<16xi32, #tpu.memory_space<smem>>
      %c2_i32_16 = arith.constant 2 : i32
      %c0_i32_17 = arith.constant 0 : i32
      %29 = tpu.memref_slice %arg5[%28, %c0_i32_17] : memref<128x32xf32, #tpu.memory_space<any>> -> memref<1x32xf32, #tpu.memory_space<any>>
      %c0_i32_18 = arith.constant 0 : i32
      %30 = tpu.memref_slice %arg8[%14, %c0_i32_18] : memref<16x32xf32, #tpu.memory_space<any>> -> memref<1x32xf32, #tpu.memory_space<any>>
      %31 = tpu.memref_slice %arg9[%c2_i32_16] : memref<3x!tpu.dma_semaphore, #tpu.memory_space<semaphore_mem>> -> memref<1x!tpu.dma_semaphore, #tpu.memory_space<semaphore_mem>>
      %32 = tpu.memref_squeeze %31 : memref<1x!tpu.dma_semaphore, #tpu.memory_space<semaphore_mem>> -> memref<!tpu.dma_semaphore, #tpu.memory_space<semaphore_mem>>
      tpu.enqueue_dma source(%29 : memref<1x32xf32, #tpu.memory_space<any>>) target(%30 : memref<1x32xf32, #tpu.memory_space<any>>) target_semaphore(%32 : memref<!tpu.dma_semaphore, #tpu.memory_space<semaphore_mem>>)
    }
    %c16_i32_1 = arith.constant 16 : i32
    %c0_i32_2 = arith.constant 0 : i32
    %c0_i32_3 = arith.constant 0 : i32
    %2 = tpu.memref_slice %arg6[%0, %c0_i32_3] : memref<16x32xf32, #tpu.memory_space<any>> -> memref<16x32xf32, #tpu.memory_space<any>>
    %c0_i32_4 = arith.constant 0 : i32
    %3 = tpu.memref_slice %arg6[%0, %c0_i32_4] : memref<16x32xf32, #tpu.memory_space<any>> -> memref<16x32xf32, #tpu.memory_space<any>>
    %4 = tpu.memref_slice %arg9[%c0_i32_2] : memref<3x!tpu.dma_semaphore, #tpu.memory_space<semaphore_mem>> -> memref<1x!tpu.dma_semaphore, #tpu.memory_space<semaphore_mem>>
    %5 = tpu.memref_squeeze %4 : memref<1x!tpu.dma_semaphore, #tpu.memory_space<semaphore_mem>> -> memref<!tpu.dma_semaphore, #tpu.memory_space<semaphore_mem>>
    tpu.wait_dma2 semaphore(%5 : memref<!tpu.dma_semaphore, #tpu.memory_space<semaphore_mem>>) src(%2 : memref<16x32xf32, #tpu.memory_space<any>>) dst(%3 : memref<16x32xf32, #tpu.memory_space<any>>)
    %c1_i32_5 = arith.constant 1 : i32
    %c0_i32_6 = arith.constant 0 : i32
    %6 = tpu.memref_slice %arg7[%0, %c0_i32_6] : memref<16x32xf32, #tpu.memory_space<any>> -> memref<16x32xf32, #tpu.memory_space<any>>
    %c0_i32_7 = arith.constant 0 : i32
    %7 = tpu.memref_slice %arg7[%0, %c0_i32_7] : memref<16x32xf32, #tpu.memory_space<any>> -> memref<16x32xf32, #tpu.memory_space<any>>
    %8 = tpu.memref_slice %arg9[%c1_i32_5] : memref<3x!tpu.dma_semaphore, #tpu.memory_space<semaphore_mem>> -> memref<1x!tpu.dma_semaphore, #tpu.memory_space<semaphore_mem>>
    %9 = tpu.memref_squeeze %8 : memref<1x!tpu.dma_semaphore, #tpu.memory_space<semaphore_mem>> -> memref<!tpu.dma_semaphore, #tpu.memory_space<semaphore_mem>>
    tpu.wait_dma2 semaphore(%9 : memref<!tpu.dma_semaphore, #tpu.memory_space<semaphore_mem>>) src(%6 : memref<16x32xf32, #tpu.memory_space<any>>) dst(%7 : memref<16x32xf32, #tpu.memory_space<any>>)
    %c2_i32 = arith.constant 2 : i32
    %c0_i32_8 = arith.constant 0 : i32
    %10 = tpu.memref_slice %arg8[%0, %c0_i32_8] : memref<16x32xf32, #tpu.memory_space<any>> -> memref<16x32xf32, #tpu.memory_space<any>>
    %c0_i32_9 = arith.constant 0 : i32
    %11 = tpu.memref_slice %arg8[%0, %c0_i32_9] : memref<16x32xf32, #tpu.memory_space<any>> -> memref<16x32xf32, #tpu.memory_space<any>>
    %12 = tpu.memref_slice %arg9[%c2_i32] : memref<3x!tpu.dma_semaphore, #tpu.memory_space<semaphore_mem>> -> memref<1x!tpu.dma_semaphore, #tpu.memory_space<semaphore_mem>>
    %13 = tpu.memref_squeeze %12 : memref<1x!tpu.dma_semaphore, #tpu.memory_space<semaphore_mem>> -> memref<!tpu.dma_semaphore, #tpu.memory_space<semaphore_mem>>
    tpu.wait_dma2 semaphore(%13 : memref<!tpu.dma_semaphore, #tpu.memory_space<semaphore_mem>>) src(%10 : memref<16x32xf32, #tpu.memory_space<any>>) dst(%11 : memref<16x32xf32, #tpu.memory_space<any>>)
    return
  }
}

</mosaic_0001>

<bundles_post_ra>
// kernel: tpu_custom_call.1
= control target key start
LH: loop header
LB: loop body
LE: loop exit
PB: predicated region body
PF: predicated region fallthrough
CT: control target
= control target key end

     0   :  { %s389_s0 = inlined_call_operand.vmem [shape: s32[16], index: 0, kind: input, shape index: {}]   ;;  %s390_s3 = inlined_call_operand.vmem [shape: f32[64,32], index: 3, kind: input, shape index: {}]   ;;  %s391_s4 = inlined_call_operand.vmem [shape: f32[128,32], index: 4, kind: input, shape index: {}]   ;;  %s392_s5 = inlined_call_operand.hbm [shape: f32[16,32], index: 5, kind: output, shape index: {0}]   ;;  %s393_s6 = inlined_call_operand.hbm [shape: f32[16,32], index: 6, kind: output, shape index: {1}]   ;;  %s394_s7 = inlined_call_operand.hbm [shape: f32[16,32], index: 7, kind: output, shape index: {2}]   ;;  %s395_s1 = inlined_call_operand.vmem [shape: s32[16], index: 1, kind: input, shape index: {}]   ;;  %s396_s2 = inlined_call_operand.vmem [shape: s32[16], index: 2, kind: input, shape index: {}]  }
   0x1   :  { %s13_s26 = sshll.u32 %s389_s0, 4  ;;  %s17_s29 = sshll.u32 %s395_s1, 4  ;;  %s14_s26 = int_to_ptr.vmem [resolvable:$true] %s13_s26  ;;  %s18_s29 = int_to_ptr.vmem [resolvable:$true] %s17_s29 }
   0x2   :  { %s142_s30 = scalar_lea.vmem %s14_s26, 16  ;;  %p147_p1 = scmp.lt.s32.totalorder %s14_s26, %s14_s26 }
   0x3   :  { %p143_p0 = scmp.ne.s32.totalorder %s14_s26, %s142_s30  ;;  %p148_p2 = scmp.lt.s32.totalorder %s142_s30, %s142_s30 }
   0x5   :  { %p149_p3 = por %p148_p2, %p147_p1 }
   0x7   :  { %p150_p4 = pnand %p149_p3, %p143_p0 }
   0x9   :  { %153 = shalt.err (!%p150_p4)  }
   0xa   :  { %s266_s8 = smov [#allocation4]   ;;  %s154_s9 = scalar_lea.vmem %s18_s29, 16 }
   0xb   :  { %16 = dma.vmem_to_smem %s14_s26, 16, %s266_s8, [#allocation3] }
   0xc   :  { %p155_p5 = scmp.ne.s32.totalorder %s18_s29, %s154_s9  ;;  %p159_p6 = scmp.lt.s32.totalorder %s18_s29, %s18_s29 }
   0xd   :  { %p160_p7 = scmp.lt.s32.totalorder %s154_s9, %s154_s9 }
   0xf   :  { %p161_p8 = por %p160_p7, %p159_p6 }
  0x11   :  { %p162_p9 = pnand %p161_p8, %p155_p5 }
  0x13   :  { %165 = shalt.err (!%p162_p9)  }
  0x14   :  { %s267_s0 = smov [#allocation5]   ;;  %s21_s11 = sshll.u32 %s396_s2, 4  ;;  %s22_s11 = int_to_ptr.vmem [resolvable:$true] %s21_s11 }
  0x15   :  { %20 = dma.vmem_to_smem %s18_s29, 16, %s267_s0, [#allocation3] }
  0x16   :  { %s166_s12 = scalar_lea.vmem %s22_s11, 16  ;;  %p171_p11 = scmp.lt.s32.totalorder %s22_s11, %s22_s11 }
  0x17   :  { %p167_p10 = scmp.ne.s32.totalorder %s22_s11, %s166_s12  ;;  %p172_p12 = scmp.lt.s32.totalorder %s166_s12, %s166_s12 }
  0x19   :  { %p173_p13 = por %p172_p12, %p171_p11 }
  0x1b   :  { %p174_p0 = pnand %p173_p13, %p167_p10 }
  0x1d   :  { %177 = shalt.err (!%p174_p0)  }
  0x1e   :  { %s268_s13 = smov [#allocation6]  }
  0x1f   :  { %24 = dma.vmem_to_smem %s22_s11, 16, %s268_s13, [#allocation3] }
  0x20   :  { %254 = dma.done.wait [#allocation3], 48 }
  0x21   :  { %255 = vsyncadd [#allocation3], 4294967248 }
  0x22   :  { %26 = sfence }
  0x23   :  { %s318_s14 = smov 0  }
  0x24 LB: > { %s35_s2 = sld [smem:[#allocation4 + %s264_s14]]  ;;  %s125_s16 = sshll.u32 %s264_s14, 4  ;;  %s264_s14 = sphi %s318_s14, %s33_s14  }
  0x25   : > { %s50_s15 = sld [smem:[#allocation5 + %s264_s14]]  ;;  %s38_s20 = scalar_lea.hbm %s392_s5, %s125_s16 }
  0x26   : > { %s327_s17 = sld [smem:[#allocation6 + %s264_s14]]  ;;  %s335_s23 = scalar_lea.hbm %s393_s6, %s125_s16 }
  0x27   : > { %s343_s29 = scalar_lea.hbm %s394_s7, %s125_s16  ;;  %s180_s13 = sshll.u32 %s390_s3, 4  ;;  %s181_s13 = int_to_ptr.vmem [resolvable:$false] %s180_s13 }
  0x2a   : > { %s36_s26 = scalar_lea.vmem %s390_s3, %s35_s2  ;;  %s182_s2 = scalar_lea.vmem %s181_s13, 1024 }
  0x2b   : > { %s46_s30 = sshll.u32 %s36_s26, 4  ;;  %s51_s0 = scalar_lea.vmem %s391_s4, %s50_s15  ;;  %s47_s30 = int_to_ptr.vmem [resolvable:$true] %s46_s30 }
  0x2c   : > { %s62_s1 = sshll.u32 %s51_s0, 4  ;;  %s178_s10 = scalar_lea.vmem %s47_s30, 16  ;;  %s63_s1 = int_to_ptr.vmem [resolvable:$true] %s62_s1 }
  0x2d   : > { %p179_p1 = scmp.ne.s32.totalorder %s47_s30, %s178_s10  ;;  %p183_p2 = scmp.lt.s32.totalorder %s47_s30, %s181_s13 }
  0x2e   : > { %p184_p3 = scmp.lt.s32.totalorder %s182_s2, %s178_s10 }
  0x30   : > { %p185_p4 = por %p184_p3, %p183_p2 }
  0x32   : > { %p186_p5 = pnand %p185_p4, %p179_p1 }
  0x34   : > { %189 = shalt.err (!%p186_p5)  }
  0x35   : > { %s190_s16 = scalar_lea.hbm %s38_s20, 16  ;;  %s192_s15 = scalar_lea.hbm %s392_s5, 256 }
  0x36   : > { %p191_p6 = scmp.ne.s32.totalorder %s38_s20, %s190_s16  ;;  %p193_p7 = scmp.lt.u32.totalorder %s38_s20, %s392_s5 }
  0x37   : > { %p194_p8 = scmp.lt.u32.totalorder %s192_s15, %s190_s16  ;;  %p196_p10 = scmp.lt.u32.totalorder %s190_s16, %s38_s20 }
  0x39   : > { %p195_p9 = por %p194_p8, %p193_p7 }
  0x3b   : > { %p197_p11 = por %p196_p10, %p195_p9 }
  0x3d   : > { %p198_p12 = pnand %p197_p11, %p191_p6 }
  0x3f   : > { %201 = shalt.err (!%p198_p12)  }
  0x40   : > { %49 = dma.vmem_to_hbm [thread:$0]  %s47_s30, 16, %s38_s20, [#allocation2] }
  0x41   : > { %s67_s26 = scalar_lea.vmem %s391_s4, %s327_s17  ;;  %s202_s27 = scalar_lea.vmem %s63_s1, 16 }
  0x42   : > { %p203_p13 = scmp.ne.s32.totalorder %s63_s1, %s202_s27  ;;  %s204_s9 = sshll.u32 %s391_s4, 4  ;;  %s205_s9 = int_to_ptr.vmem [resolvable:$false] %s204_s9 }
  0x43   : > { %s206_s0 = scalar_lea.vmem %s205_s9, 2048  ;;  %p207_p0 = scmp.lt.s32.totalorder %s63_s1, %s205_s9 }
  0x44   : > { %p208_p1 = scmp.lt.s32.totalorder %s206_s0, %s202_s27 }
  0x46   : > { %p209_p2 = por %p208_p1, %p207_p0 }
  0x48   : > { %p210_p3 = pnand %p209_p2, %p203_p13 }
  0x4a   : > { %213 = shalt.err (!%p210_p3)  }
  0x4b   : > { %s214_s20 = scalar_lea.hbm %s335_s23, 16  ;;  %s216_s10 = scalar_lea.hbm %s393_s6, 256 }
  0x4c   : > { %p215_p4 = scmp.ne.s32.totalorder %s335_s23, %s214_s20  ;;  %p217_p5 = scmp.lt.u32.totalorder %s335_s23, %s393_s6 }
  0x4d   : > { %p218_p6 = scmp.lt.u32.totalorder %s216_s10, %s214_s20  ;;  %p220_p8 = scmp.lt.u32.totalorder %s214_s20, %s335_s23 }
  0x4f   : > { %p219_p7 = por %p218_p6, %p217_p5 }
  0x51   : > { %p221_p9 = por %p220_p8, %p219_p7 }
  0x53   : > { %p222_p10 = pnand %p221_p9, %p215_p4 }
  0x55   : > { %225 = shalt.err (!%p222_p10)  }
  0x56   : > { %65 = dma.vmem_to_hbm [thread:$0]  %s63_s1, 16, %s335_s23, [#allocation2 + $0x1] }
  0x57   : > { %s78_s13 = sshll.u32 %s67_s26, 4  ;;  %s79_s13 = int_to_ptr.vmem [resolvable:$true] %s78_s13 }
  0x58   : > { %s226_s2 = scalar_lea.vmem %s79_s13, 16  ;;  %p231_p12 = scmp.lt.s32.totalorder %s79_s13, %s205_s9 }
  0x59   : > { %p227_p11 = scmp.ne.s32.totalorder %s79_s13, %s226_s2  ;;  %p232_p13 = scmp.lt.s32.totalorder %s206_s0, %s226_s2 }
  0x5b   : > { %p233_p0 = por %p232_p13, %p231_p12 }
  0x5d   : > { %p234_p1 = pnand %p233_p0, %p227_p11 }
  0x5f   : > { %237 = shalt.err (!%p234_p1)  }
  0x60   : > { %s238_s16 = scalar_lea.hbm %s343_s29, 16  ;;  %s240_s15 = scalar_lea.hbm %s394_s7, 256 }
  0x61   : > { %p239_p2 = scmp.ne.s32.totalorder %s343_s29, %s238_s16  ;;  %p241_p3 = scmp.lt.u32.totalorder %s343_s29, %s394_s7 }
  0x62   : > { %p242_p4 = scmp.lt.u32.totalorder %s240_s15, %s238_s16  ;;  %p244_p6 = scmp.lt.u32.totalorder %s238_s16, %s343_s29 }
  0x64   : > { %p243_p5 = por %p242_p4, %p241_p3 }
  0x66   : > { %p245_p7 = por %p244_p6, %p243_p5 }
  0x68   : > { %p246_p8 = pnand %p245_p7, %p239_p2 }
  0x6a   : > { %249 = shalt.err (!%p246_p8)  }
  0x6b   : > { %81 = dma.vmem_to_hbm [thread:$0]  %s79_s13, 16, %s343_s29, [#allocation2 + $0x2] }
  0x6c   : > { %s33_s14 = sadd.s32 1, %s264_s14  }
  0x6d   : > { %p30_p9 = scmp.ge.s32.totalorder %s33_s14, 16  }
  0x6f   :  { %32 = sbr.rel (!%p30_p9) target bundleno = 36 (0x24), region = 43 }
  0x76   :  { %256 = dma.done.wait [#allocation2], 256 }
  0x77   :  { %257 = vsyncadd [#allocation2], 4294967040 }
  0x78   :  { %258 = dma.done.wait [#allocation2 + $0x1], 256 }
  0x79   :  { %259 = vsyncadd [#allocation2 + $0x1], 4294967040 }
  0x7a   :  { %260 = dma.done.wait [#allocation2 + $0x2], 256 }
  0x7b   :  { %261 = vsyncadd [#allocation2 + $0x2], 4294967040 }
  0x7c   :  { %91 = vsyncmov [#allocation2] }
  0x7f   :  { %s92_s21 = vpop.sfrf %91 }
  0x80   :  { %p128_p10 = scmp.ne.s32.totalorder %s92_s21, 0 }
  0x82   :  { %96 = shalt.err (%p128_p10)  }
  0x83   :  { %98 = vsyncmov [#allocation2 + $0x1] }
  0x86   :  { %s99_s22 = vpop.sfrf %98 }
  0x87   :  { %p129_p11 = scmp.ne.s32.totalorder %s99_s22, 0 }
  0x89   :  { %103 = shalt.err (%p129_p11)  }
  0x8a   :  { %105 = vsyncmov [#allocation2 + $0x2] }
  0x8d   :  { %s106_s29 = vpop.sfrf %105 }
  0x8e   :  { %p130_p12 = scmp.ne.s32.totalorder %s106_s29, 0 }
  0x90   :  { %110 = shalt.err (%p130_p12)  }

</bundles_post_ra>
